<compile_context>
chip_gen: v7x
topology: tpu7x:2x2x1
jax: 0.10.0
libtpu: 0.0.40
codegen_flags: <defaults>
</compile_context>

<pallas_src>
import numpy as np
import jax
import jax.numpy as jnp
from jax import lax
from jax.experimental import pallas as pl
from jax.experimental.pallas import tpu as pltpu


def _round_up(x, m):
    return ((x + m - 1) // m) * m


def _cdiv(a, b):
    return -(-a // b)


def _dot_cos_kernel(ts_ref, fp_ref, out_ref):
    """MXU-fused path (default).

    ts_ref : (tile_r, K) f32   columns = [ts_0 .. ts_{P-1}, 1.0, 0-pad]
    fp_ref : (K, W)      f32   rows    = [group-masked freq rows, phase, 0-pad]
    out_ref: (tile_r, W)       W multiple of 128 -> fully lane-dense stores

    x[r, l] = ts[r, g(l)] * freq[j(l)] + 1.0 * phase[j(l)]  (+ exact 0 terms).
    The matmul runs on the otherwise-idle MXU slot; the VPU only runs cos.
    """
    x = jnp.dot(ts_ref[...], fp_ref[...],
                preferred_element_type=jnp.float32,
                precision=lax.Precision.HIGHEST)
    out_ref[...] = jnp.cos(x).astype(out_ref.dtype)


def _mac_tree_cos_kernel(ts_ref, fsel_ref, phase_ref, out_ref):
    """Exact-f32 VPU fallback (use_mxu=False): balanced-tree masked MAC.

    The tree (instead of a serial x = x + term chain) lets the scheduler
    co-issue the adds across the 4 VALU slots.
    """
    ts = ts_ref[...]                                    # (tile_r, P)
    p = ts.shape[1]
    terms = [ts[:, g:g + 1] * fsel_ref[g:g + 1, :] for g in range(p)]
    while len(terms) > 1:
        nxt = [terms[i] + terms[i + 1] for i in range(0, len(terms) - 1, 2)]
        if len(terms) % 2:
            nxt.append(terms[-1])
        terms = nxt
    out_ref[...] = jnp.cos(terms[0] + phase_ref[...]).astype(out_ref.dtype)


def _pick_tile(r_rows, tile_rows, row_align):
    """Row-tile size + padded row count.

    Guarantees tile_r % row_align == 0 and R % tile_r == 0, and — when there
    is enough work — at least 2 grid steps so dimension_semantics=("parallel",)
    can shard the 1-D grid across v7x's two TensorCores (no-op on v5e/v6e).
    """
    r_al = _round_up(r_rows, row_align)
    tile_r = min(_round_up(tile_rows, row_align), r_al)
    if r_al // tile_r < 2 and r_al >= 2 * row_align:
        tile_r = _round_up(_cdiv(r_al, 2), row_align)
    r_total = _round_up(r_rows, tile_r)
    return tile_r, r_total


def time_encode(ts, basis_freq, phase, *, out_dtype=jnp.float32,
                tile_rows=2048, use_pallas=None, use_mxu=True):
    """Pallas TimeEncode forward.

    ts:          (B, L) float timestamps
    basis_freq:  (D,)   float
    phase:       (D,)   float
    out_dtype:   output dtype (f32 default; pass bfloat16 on writeback-bound
                 v5e/v6e when the consumer accepts it)
    tile_rows:   packed-row tile size (sweep 2048-4096; VMEM-capped below)
    use_pallas:  None = auto-skip the kernel for tiny inputs; True/False force
    use_mxu:     True  -> fused MXU matmul for replication+freq+phase (fast)
                 False -> exact-f32 VPU balanced-tree MAC (bit-tight numerics)
    returns:     (B, L, D) out_dtype
    """
    B, L = ts.shape
    D = basis_freq.shape[0]
    N = B * L

    ts = ts.astype(jnp.float32)
    freq = basis_freq.astype(jnp.float32)
    ph = phase.astype(jnp.float32)

    if use_pallas is None:
        use_pallas = N * D >= 128 * 128
    if not use_pallas:
        out = jnp.cos(ts[:, :, None] * freq[None, None, :] + ph[None, None, :])
        return out.astype(out_dtype)

    # ---- output lane layout -------------------------------------------------
    if D <= 128 and 128 % D == 0:
        P, W = 128 // D, 128            # pack P logical rows per 128-lane row
    else:
        # Lane-pad D so every vector store is unmasked; wrapper slices [:, :D].
        # (Inflates HBM writes by W/D — on writeback-bound v5e pair this with
        #  out_dtype=bfloat16 if W/D is large.)
        P, W = 1, _round_up(D, 128)

    itemsize = jnp.dtype(out_dtype).itemsize
    row_align = 8 if itemsize >= 4 else (16 if itemsize == 2 else 32)

    r_rows = _cdiv(N, P)                # packed rows needed

    # ---- VMEM budget (v7x: 64 MiB physical / 32 MiB scoped default) ---------
    # Per grid step, double-buffered: output block (tile_r, W)*itemsize plus
    # the ts block, which is lane-padded to (tile_r, 128) f32 tiles in VMEM
    # even though only K (or P) lanes are useful.  Keep 2*(out + ts) <= 24 MiB.
    bytes_per_row = 2 * (W * itemsize + 128 * 4)
    max_tile = max(row_align,
                   ((24 << 20) // bytes_per_row) // row_align * row_align)
    tile_r, R = _pick_tile(r_rows, min(tile_rows, max_tile), row_align)
    n_pad = R * P

    # ---- pack ts (cheap wrapper-side ops on ~N floats) -----------------------
    ts_flat = ts.reshape(N)
    if n_pad != N:
        ts_flat = jnp.pad(ts_flat, (0, n_pad - N))      # 4 bytes per pad row
    ts_packed = ts_flat.reshape(R, P)

    # Group-masked frequency matrix: fsel[g, g*D + j] = freq[j], 0 elsewhere.
    fsel = (jnp.eye(P, dtype=jnp.float32)[:, :, None]
            * freq[None, None, :]).reshape(P, P * D)
    ph_row = jnp.tile(ph, P)
    if W > P * D:
        fsel = jnp.pad(fsel, ((0, 0), (0, W - P * D)))
        ph_row = jnp.pad(ph_row, (0, W - P * D))
    ph_row = ph_row.reshape(1, W)

    cparams = pltpu.CompilerParams(dimension_semantics=("parallel",))
    grid = (R // tile_r,)

    if use_mxu:
        # Fold replication + freq scaling + phase add into one MXU matmul.
        K = _round_up(P + 1, 8)         # contraction dim incl. the ones column
        cols = [ts_packed, jnp.ones((R, 1), jnp.float32)]
        rows = [fsel, ph_row]
        if K > P + 1:
            cols.append(jnp.zeros((R, K - P - 1), jnp.float32))
            rows.append(jnp.zeros((K - P - 1, W), jnp.float32))
        ts_aug = jnp.concatenate(cols, axis=1)          # (R, K)
        fp = jnp.concatenate(rows, axis=0)              # (K, W)

        cost = pl.CostEstimate(
            flops=2 * R * W * K,
            transcendentals=R * W,
            bytes_accessed=R * W * itemsize + 4 * (R * K + K * W))

        out2d = pl.pallas_call(
            _dot_cos_kernel,
            out_shape=jax.ShapeDtypeStruct((R, W), out_dtype),
            grid=grid,
            in_specs=[
                pl.BlockSpec((tile_r, K), lambda i: (i, 0)),   # ts tile
                pl.BlockSpec((K, W), lambda i: (0, 0)),        # freq/phase (resident)
            ],
            out_specs=pl.BlockSpec((tile_r, W), lambda i: (i, 0)),
            compiler_params=cparams,
            cost_estimate=cost,
        )(ts_aug, fp)
    else:
        cost = pl.CostEstimate(
            flops=(2 * P + 1) * R * W,
            transcendentals=R * W,
            bytes_accessed=R * W * itemsize + 4 * (R * P + (P + 1) * W))

        out2d = pl.pallas_call(
            _mac_tree_cos_kernel,
            out_shape=jax.ShapeDtypeStruct((R, W), out_dtype),
            grid=grid,
            in_specs=[
                pl.BlockSpec((tile_r, P), lambda i: (i, 0)),   # ts tile
                pl.BlockSpec((P, W), lambda i: (0, 0)),        # fsel (resident)
                pl.BlockSpec((1, W), lambda i: (0, 0)),        # phase (resident)
            ],
            out_specs=pl.BlockSpec((tile_r, W), lambda i: (i, 0)),
            compiler_params=cparams,
            cost_estimate=cost,
        )(ts_packed, fsel, ph_row)

    # ---- unpack: contiguous reshape / static slice (free) --------------------
    if W == P * D:
        out = out2d.reshape(n_pad, D)
        if n_pad != N:
            out = out[:N]
    else:                               # P == 1, lane-padded output columns
        out = out2d[:, :D]
        if n_pad != N:
            out = out[:N]
    return out.reshape(B, L, D)


def make_time_encode_params(expand_dim):
    """Deterministic parameter init matching TimeEncode.__init__."""
    basis_freq = jnp.asarray(
        1.0 / 10.0 ** np.linspace(0, 9, expand_dim), dtype=jnp.float32)
    phase = jnp.zeros((expand_dim,), dtype=jnp.float32)
    return basis_freq, phase


if __name__ == "__main__":
    key = jax.random.PRNGKey(0)
    k1, k2, k3, k4, k5 = jax.random.split(key, 5)

    def ref_fn(t, f, p):
        return jnp.cos(t[:, :, None] * f[None, None, :] + p[None, None, :])

    # Tolerances:
    #  * use_mxu=False is exact f32 -> 1e-5.
    #  * use_mxu=True goes through the MXU's multi-pass f32 decomposition;
    #    with precision=HIGHEST the argument error is tiny, but cos is
    #    argument-sensitive for |ts*freq| up to ~100, so 2e-3 is a conservative
    #    bound that also covers a 3-pass decomposition.
    MXU_TOL = 2e-3

    # 1) Module-consistent small shape (batch=2, seq=8, time_dim=32):
    #    exact VPU path at tight tolerance.
    B, L, D = 2, 8, 32
    basis_freq, phase = make_time_encode_params(D)
    ts = jax.random.uniform(k1, (B, L), dtype=jnp.float32) * 100.0
    ref = ref_fn(ts, basis_freq, phase)
    out = jax.block_until_ready(
        time_encode(ts, basis_freq, phase, use_pallas=True, use_mxu=False))
    assert out.shape == (B, L, D)
    np.testing.assert_allclose(np.asarray(out), np.asarray(ref),
                               rtol=1e-5, atol=1e-5)

    # 2) Same input through the default MXU-fused path.
    out = jax.block_until_ready(time_encode(ts, basis_freq, phase, use_pallas=True))
    np.testing.assert_allclose(np.asarray(out), np.asarray(ref),
                               rtol=MXU_TOL, atol=MXU_TOL)

    # 3) Ragged multi-tile case with non-zero phase: N = 3*1501 = 4503 rows
    #    -> >= 2 grid steps, row padding, lane packing, phase folded into MXU.
    B2, L2 = 3, 1501
    ts2 = jax.random.uniform(k2, (B2, L2), dtype=jnp.float32) * 100.0
    phase2 = jax.random.normal(k3, (D,), dtype=jnp.float32)
    ref2 = ref_fn(ts2, basis_freq, phase2)
    out2 = jax.block_until_ready(time_encode(ts2, basis_freq, phase2, use_pallas=True))
    np.testing.assert_allclose(np.asarray(out2), np.asarray(ref2),
                               rtol=MXU_TOL, atol=MXU_TOL)
    out2e = jax.block_until_ready(
        time_encode(ts2, basis_freq, phase2, use_pallas=True, use_mxu=False))
    np.testing.assert_allclose(np.asarray(out2e), np.asarray(ref2),
                               rtol=1e-5, atol=1e-5)

    # 4) Generic path (D=48 does not divide 128): lane-padded, unmasked stores.
    D3 = 48
    bf3, ph3 = make_time_encode_params(D3)
    ts3 = jax.random.uniform(k4, (2, 200), dtype=jnp.float32) * 100.0
    ref3 = ref_fn(ts3, bf3, ph3)
    out3 = jax.block_until_ready(time_encode(ts3, bf3, ph3, use_pallas=True))
    np.testing.assert_allclose(np.asarray(out3), np.asarray(ref3),
                               rtol=MXU_TOL, atol=MXU_TOL)

    # 5) bf16 output (halves HBM writeback on v5e/v6e); tile rows rounded to 16.
    ts4 = jax.random.uniform(k5, (4, 300), dtype=jnp.float32) * 100.0
    ref4 = ref_fn(ts4, basis_freq, phase)
    out4 = jax.block_until_ready(
        time_encode(ts4, basis_freq, phase, out_dtype=jnp.bfloat16, use_pallas=True))
    np.testing.assert_allclose(np.asarray(out4, dtype=np.float32), np.asarray(ref4),
                               rtol=2e-2, atol=1e-2)

    print("KERNEL_OK")
</pallas_src>

<mosaic_0001>
module attributes {stable_mosaic.version = 11 : i64} {
  func.func @_mac_tree_cos_kernel(%arg0: i32, %arg1: memref<8x4xf32, #tpu.memory_space<vmem>>, %arg2: memref<4x128xf32, #tpu.memory_space<vmem>>, %arg3: memref<1x128xf32, #tpu.memory_space<vmem>>, %arg4: memref<8x128xf32, #tpu.memory_space<vmem>>) attributes {dimension_semantics = [#tpu.dimension_semantics<parallel>], iteration_bounds = array<i64: 1>, scalar_prefetch = 0 : i64, scratch_operands = 0 : i64, tpu.core_type = #tpu.core_type<tc>, window_params = [{transform_indices = @transform_0, window_bounds = array<i64: 8, 4>}, {pipeline_mode = #tpu.pipeline_mode<synchronous>, transform_indices = @transform_1, window_bounds = array<i64: 4, 128>}, {pipeline_mode = #tpu.pipeline_mode<synchronous>, transform_indices = @transform_2, window_bounds = array<i64: 1, 128>}, {transform_indices = @transform_3, window_bounds = array<i64: 8, 128>}]} {
    %c0 = arith.constant 0 : index
    %c0_0 = arith.constant 0 : index
    %0 = vector.load %arg1[%c0, %c0_0] : memref<8x4xf32, #tpu.memory_space<vmem>>, vector<8x4xf32>
    %1 = vector.extract_strided_slice %0 {offsets = [0, 0], sizes = [8, 1], strides = [1, 1]} : vector<8x4xf32> to vector<8x1xf32>
    %c0_1 = arith.constant 0 : index
    %c0_2 = arith.constant 0 : index
    %2 = vector.load %arg2[%c0_1, %c0_2] : memref<4x128xf32, #tpu.memory_space<vmem>>, vector<1x128xf32>
    %3 = vector.broadcast %1 : vector<8x1xf32> to vector<8x128xf32>
    %4 = vector.broadcast %2 : vector<1x128xf32> to vector<8x128xf32>
    %5 = arith.mulf %3, %4 : vector<8x128xf32>
    %6 = vector.extract_strided_slice %0 {offsets = [0, 1], sizes = [8, 1], strides = [1, 1]} : vector<8x4xf32> to vector<8x1xf32>
    %c1 = arith.constant 1 : index
    %c0_3 = arith.constant 0 : index
    %7 = vector.load %arg2[%c1, %c0_3] : memref<4x128xf32, #tpu.memory_space<vmem>>, vector<1x128xf32>
    %8 = vector.broadcast %6 : vector<8x1xf32> to vector<8x128xf32>
    %9 = vector.broadcast %7 : vector<1x128xf32> to vector<8x128xf32>
    %10 = arith.mulf %8, %9 : vector<8x128xf32>
    %11 = vector.extract_strided_slice %0 {offsets = [0, 2], sizes = [8, 1], strides = [1, 1]} : vector<8x4xf32> to vector<8x1xf32>
    %c2 = arith.constant 2 : index
    %c0_4 = arith.constant 0 : index
    %12 = vector.load %arg2[%c2, %c0_4] : memref<4x128xf32, #tpu.memory_space<vmem>>, vector<1x128xf32>
    %13 = vector.broadcast %11 : vector<8x1xf32> to vector<8x128xf32>
    %14 = vector.broadcast %12 : vector<1x128xf32> to vector<8x128xf32>
    %15 = arith.mulf %13, %14 : vector<8x128xf32>
    %16 = vector.extract_strided_slice %0 {offsets = [0, 3], sizes = [8, 1], strides = [1, 1]} : vector<8x4xf32> to vector<8x1xf32>
    %c3 = arith.constant 3 : index
    %c0_5 = arith.constant 0 : index
    %17 = vector.load %arg2[%c3, %c0_5] : memref<4x128xf32, #tpu.memory_space<vmem>>, vector<1x128xf32>
    %18 = vector.broadcast %16 : vector<8x1xf32> to vector<8x128xf32>
    %19 = vector.broadcast %17 : vector<1x128xf32> to vector<8x128xf32>
    %20 = arith.mulf %18, %19 : vector<8x128xf32>
    %21 = arith.addf %5, %10 : vector<8x128xf32>
    %22 = arith.addf %15, %20 : vector<8x128xf32>
    %23 = arith.addf %21, %22 : vector<8x128xf32>
    %c0_6 = arith.constant 0 : index
    %c0_7 = arith.constant 0 : index
    %24 = vector.load %arg3[%c0_6, %c0_7] : memref<1x128xf32, #tpu.memory_space<vmem>>, vector<1x128xf32>
    %25 = vector.broadcast %24 : vector<1x128xf32> to vector<8x128xf32>
    %26 = arith.addf %23, %25 : vector<8x128xf32>
    %27 = math.cos %26 : vector<8x128xf32>
    %c0_8 = arith.constant 0 : index
    %c0_9 = arith.constant 0 : index
    %28 = vector.load %arg4[%c0_8, %c0_9] : memref<8x128xf32, #tpu.memory_space<vmem>>, vector<8x128xf32>
    tpu.vector_store %arg4[%c0_8, %c0_9], %27 {strides = array<i32>} : memref<8x128xf32, #tpu.memory_space<vmem>>, vector<8x128xf32>,
    return
  }
  func.func @transform_0(%arg0: i32) -> (i32, i32) {
    %c0_i32 = arith.constant 0 : i32
    %c0_i32_0 = arith.constant 0 : i32
    return %arg0, %c0_i32 : i32, i32
  }
  func.func @transform_1(%arg0: i32) -> (i32, i32) {
    %c0_i32 = arith.constant 0 : i32
    %c0_i32_0 = arith.constant 0 : i32
    %c0_i32_1 = arith.constant 0 : i32
    return %c0_i32, %c0_i32_0 : i32, i32
  }
  func.func @transform_2(%arg0: i32) -> (i32, i32) {
    %c0_i32 = arith.constant 0 : i32
    %c0_i32_0 = arith.constant 0 : i32
    %c0_i32_1 = arith.constant 0 : i32
    return %c0_i32, %c0_i32_0 : i32, i32
  }
  func.func @transform_3(%arg0: i32) -> (i32, i32) {
    %c0_i32 = arith.constant 0 : i32
    %c0_i32_0 = arith.constant 0 : i32
    return %arg0, %c0_i32 : i32, i32
  }
}

</mosaic_0001>

<bundles_post_ra>
// kernel: tpu_custom_call.1
= control target key start
LH: loop header
LB: loop body
LE: loop exit
PB: predicated region body
PF: predicated region fallthrough
CT: control target
= control target key end

     0   :  { %v243_v1 = vmov 2   ;;  %v244_v2 = vmov 0   ;;  %s325_s0 = inlined_call_operand.vmem [shape: f32[8,4], index: 0, kind: input, shape index: {}]   ;;  %s326_s1 = inlined_call_operand.vmem [shape: f32[4,128], index: 1, kind: input, shape index: {}]   ;;  %s327_s2 = inlined_call_operand.vmem [shape: f32[1,128], index: 2, kind: input, shape index: {}]   ;;  %s328_s3 = inlined_call_operand.hbm [shape: f32[8,128], index: 3, kind: output, shape index: {}]  }
   0x1   :  { %v15_v0 = vld [vmem:[%s325_s0] sm:$0xff]  ;;  %212 = vset.pattern.permute.xlu1 %v243_v1  ;;  %210 = vset.pattern.permute.xlu0 %v244_v2 }
   0x2   :  { %8 = vsyncpa [#allocation3], 0  ;;  %39 = vperm.xlu1 %212, %v15_v0   ;;  %19 = vperm.xlu0 %210, %v15_v0   ;;  %v245_v3 = vmov 3   ;;  %v246_v4 = vmov 1   ;;  %v188_v7 = vld [vmem:[%s326_s1 + $0x2] ss:$0 sm:$0xff] }
   0x3   :  { %v186_v8 = vld [vmem:[%s326_s1] ss:$0 sm:$0xff]  ;;  %v189_v9 = vld [vmem:[%s326_s1 + $0x3] ss:$0 sm:$0xff]  ;;  %v187_v10 = vld [vmem:[%s326_s1 + $0x1] ss:$0 sm:$0xff] }
   0x4   :  { %v190_v19 = vld [vmem:[%s327_s2] ss:$0 sm:$0xff]  ;;  %v247_v32 = vmov 683565275   ;;  %v248_v34 = vmov 2475754826  }
   0x5   :  { %v249_v37 = vmov 2131351028   ;;  %v250_v40 = vmov 2102212464   ;;  %v251_v43 = vmov 920167782  }
   0x6   :  { %213 = vset.pattern.permute.xlu1 %v245_v3  ;;  %211 = vset.pattern.permute.xlu0 %v246_v4  ;;  %v252_v46 = vmov 1326507024   ;;  %s253_s1 = smov [#allocation2]  }
   0x7   :  { %49 = vperm.xlu1 %213, %v15_v0   ;;  %29 = vperm.xlu0 %211, %v15_v0   ;;  %s178_s2 = sshll.u32 %s253_s1, 4  ;;  %s179_s2 = int_to_ptr.vmem [resolvable:$true] %s178_s2 }
   0x8   :  { %s219_s23 = scalar_lea.vmem %s179_s2, 128  ;;  %p224_p1 = scmp.lt.s32.totalorder %s179_s2, %s179_s2 }
   0x9   :  { %p220_p0 = scmp.ne.s32.totalorder %s179_s2, %s219_s23  ;;  %p225_p2 = scmp.lt.s32.totalorder %s219_s23, %s219_s23 }
   0xb   :  { %214 = vset.pattern.permute.xlu0 %v245_v3  ;;  %p226_p3 = por %p225_p2, %p224_p1 }
   0xd   :  { %p227_p4 = pnand %p226_p3, %p220_p0 }
  0x81   :  { %v40_v5 = vpop.permute.xlu1 %39  ;;  %v20_v6 = vpop.permute.xlu0 %19 }
  0x82   :  { %v46_v13 = vmul.f32 %v188_v7, %v40_v5  ;;  %v26_v14 = vmul.f32 %v186_v8, %v20_v6 }
  0x86   :  { %v50_v11 = vpop.permute.xlu1 %49  ;;  %v30_v12 = vpop.permute.xlu0 %29 }
  0x87   :  { %v56_v15 = vmul.f32 %v189_v9, %v50_v11  ;;  %v36_v16 = vmul.f32 %v187_v10, %v30_v12 }
  0x89   :  { %v58_v17 = vadd.f32 %v56_v15, %v46_v13  ;;  %v57_v18 = vadd.f32 %v36_v16, %v26_v14 }
  0x8b   :  { %v59_v20 = vadd.f32 %v58_v17, %v57_v18 }
  0x8d   :  { %v292_v21 = vadd.f32 %v190_v19, %v59_v20 }
  0x8f   :  { %v71_v22 = vand.u32 2139095040, %v292_v21  ;;  %v68_v26 = vand.u32 2147483647, %v292_v21  ;;  %vm70_vm7 = vcmp.lt.s32.totalorder %v292_v21, 0  ;;  %vm160_vm12 = vweird.f32 %v292_v21 }
  0x91   :  { %v72_v23 = vshrl.u32 %v71_v22, 23  ;;  %v75_v30 = vand.u32 8388607, %v68_v26  ;;  %vm69_vm8 = vcmp.le.f32.partialorder %v68_v26, 0.7853982 }
  0x93   :  { %v191_v24 = vadd.s32 4294967169, %v72_v23  ;;  %v76_v48 = vor.u32 8388608, %v75_v30 }
  0x95   :  { %v78_v25 = vadd.s32 1, %v191_v24  ;;  %v116_v62 = vshll.u32 %v76_v48, 8 }
  0x97   :  { %vm79_vm0 = vcmp.gt.s32.totalorder %v78_v25, 0 }
  0x98   :  { %v80_v27 = vsel %vm79_vm0, %v78_v25, 0 }
  0x99   :  { %v82_v28 = vand.u32 31, %v80_v27  ;;  %v81_v31 = vshrl.u32 %v80_v27, 5 }
  0x9b   :  { %v83_v29 = vsub.s32 32, %v82_v28  ;;  %v85_v33 = vshll.u32 %v247_v32, %v82_v28  ;;  %v88_v35 = vshll.u32 %v248_v34, %v82_v28  ;;  %v91_v39 = vshll.u32 %v249_v37, %v82_v28 }
  0x9c   :  { %v94_v42 = vshll.u32 %v250_v40, %v82_v28  ;;  %v97_v45 = vshll.u32 %v251_v43, %v82_v28  ;;  %vm100_vm1 = vcmp.lt.s32.totalorder %v81_v31, 1  ;;  %vm103_vm2 = vcmp.lt.s32.totalorder %v81_v31, 4 }
  0x9d   :  { %v86_v36 = vshrl.u32 %v248_v34, %v83_v29  ;;  %v89_v38 = vshrl.u32 %v249_v37, %v83_v29  ;;  %v92_v41 = vshrl.u32 %v250_v40, %v83_v29  ;;  %v95_v44 = vshrl.u32 %v251_v43, %v83_v29 }
  0x9e   :  { %v98_v47 = vshrl.u32 %v252_v46, %v83_v29  ;;  %v84_v57 = vshrl.u32 %v247_v32, %v83_v29  ;;  %vm102_vm3 = vcmp.lt.s32.totalorder %v81_v31, 3  ;;  %vm101_vm4 = vcmp.lt.s32.totalorder %v81_v31, 2 }
  0x9f   :  { %v87_v49 = vor.u32 %v86_v36, %v85_v33  ;;  %v90_v50 = vor.u32 %v89_v38, %v88_v35  ;;  %v93_v51 = vor.u32 %v92_v41, %v91_v39  ;;  %v96_v52 = vor.u32 %v95_v44, %v94_v42 }
  0xa0   :  { %v99_v53 = vor.u32 %v98_v47, %v97_v45 }
  0xa1   :  { %v105_v54 = vsel %vm103_vm2, %v93_v51, 2102212464  ;;  %v108_v55 = vsel %vm100_vm1, %v87_v49, %v90_v50  ;;  %v112_v56 = vsel %vm100_vm1, %v90_v50, %v93_v51  ;;  %v109_v58 = vsel %vm103_vm2, %v96_v52, 920167782 }
  0xa2   :  { %v113_v59 = vsel %vm103_vm2, %v99_v53, 1326507024  ;;  %v110_v60 = vsel %vm102_vm3, %v93_v51, %v109_v58  ;;  %v104_v63 = vsel %vm100_vm1, %v84_v57, %v87_v49  ;;  %v106_v0 = vsel %vm102_vm3, %v90_v50, %v105_v54 }
  0xa3   :  { %v114_v61 = vsel %vm102_vm3, %v96_v52, %v113_v59  ;;  %v111_v1 = vsel %vm101_vm4, %v108_v55, %v110_v60  ;;  %v107_v7 = vsel %vm101_vm4, %v104_v63, %v106_v0 }
  0xa4   :  { %v115_v2 = vsel %vm101_vm4, %v112_v56, %v114_v61  ;;  %v301_v5 = vmul.u32.u64.low %v116_v62, %v111_v1  ;;  %v302_v6 = vmul.u32.u64.high %v116_v62, %v111_v1, %v301_v5  ;;  %v123_v9 = vmul.u32 %v116_v62, %v107_v7 }
  0xa5   :  { %v298_v3 = vmul.u32.u64.low %v116_v62, %v115_v2  ;;  %v299_v4 = vmul.u32.u64.high %v116_v62, %v115_v2, %v298_v3 }
  0xa6   :  { %v126_v8 = vadd.s32 1, %v302_v6 }
  0xa7   :  { %vm125_vm5 = vc.u32 %v299_v4, %v301_v5  ;;  %v124_v22 = vadd.s32 %v301_v5, %v299_v4 }
  0xa8   :  { %v127_v10 = vsel %vm125_vm5, %v126_v8, %v302_v6 }
  0xa9   :  { %v128_v11 = vadd.s32 %v127_v10, %v123_v9 }
  0xab   :  { %v129_v12 = vadd.s32 536870912, %v128_v11 }
  0xad   :  { %v130_v13 = vshrl.u32 %v129_v12, 30 }
  0xaf   :  { %v131_v14 = vshll.u32 %v130_v13, 30  ;;  %v154_v37 = vsub.s32 4, %v130_v13 }
  0xb1   :  { %v132_v15 = vsub.s32 %v128_v11, %v131_v14  ;;  %v155_v39 = vsel %vm70_vm7, %v154_v37, %v130_v13 }
  0xb2   :  { %v157_v40 = vsel %vm69_vm8, 0, %v155_v39 }
  0xb3   :  { %v134_v16 = vsub.s32 0, %v132_v15  ;;  %v161_v41 = vand.u32 3, %v157_v40 }
  0xb5   :  { %v192_v17 = vmin.u32 %v134_v16, %v132_v15  ;;  %vm166_vm9 = vcmp.eq.s32.totalorder %v161_v41, 2  ;;  %vm163_vm10 = vcmp.eq.s32.totalorder %v161_v41, 0  ;;  %vm162_vm11 = vcmp.lt.s32.totalorder %v161_v41, 2 }
  0xb7   :  { %v136_v18 = vclz %v192_v17 }
  0xb9   :  { %v193_v19 = vadd.s32 4294967294, %v136_v18 }
  0xbb   :  { %vm194_vm6 = vcmp.lt.s32.totalorder %v193_v19, 0 }
  0xbc   :  { %v139_v20 = vsel %vm194_vm6, 0, %v193_v19 }
  0xbd   :  { %v140_v23 = vsub.s32 32, %v139_v20  ;;  %v144_v24 = vsub.s32 4294967266, %v139_v20  ;;  %v141_v25 = vshll.u32 %v132_v15, %v139_v20 }
  0xbf   :  { %v142_v27 = vshrl.u32 %v124_v22, %v140_v23  ;;  %v145_v28 = vadd.s32 127, %v144_v24 }
  0xc1   :  { %v143_v29 = vor.u32 %v142_v27, %v141_v25  ;;  %v146_v30 = vshll.u32 %v145_v28, 23 }
  0xc3   :  { %v147_v31 = vor.u32 4788187, %v146_v30  ;;  %v150_v33 = vcvt.s32.f32 %v143_v29 }
  0xc5   :  { %v148_v32 = vand.u32 2147483647, %v147_v31 }
  0xc7   :  { %v151_v34 = vmul.f32 %v150_v33, %v148_v32 }
  0xc9   :  { %v152_v35 = vxor.u32 2147483648, %v151_v34 }
  0xcb   :  { %v153_v36 = vsel %vm70_vm7, %v152_v35, %v151_v34 }
  0xcc   :  { %v156_v38 = vsel %vm69_vm8, %v292_v21, %v153_v36 }
  0xcd   :  { %215 = vcosq.f32 %v156_v38 }
  0xce   :  { %217 = vsinq.f32 %v156_v38 }
  0xd7   :  { %v216_v42 = vpop.eup %215 }
  0xd8   :  { %v218_v43 = vpop.eup %217  ;;  %v167_v44 = vxor.u32 2147483648, %v216_v42 }
  0xd9   :  { %v164_v45 = vxor.u32 2147483648, %v218_v43 }
  0xda   :  { %v168_v46 = vsel %vm166_vm9, %v167_v44, %v218_v43 }
  0xdb   :  { %v165_v26 = vsel %vm163_vm10, %v216_v42, %v164_v45 }
  0xdc   :  { %v169_v47 = vsel %vm162_vm11, %v165_v26, %v168_v46 }
  0xdd   :  { %v170_v48 = vsel %vm160_vm12, nan, %v169_v47 }
  0xde   :  { %171 = vst [vmem:[#allocation2] sm:$0xff] %v170_v48 }
  0xdf   :  { %230 = shalt.err (!%p227_p4)
}
  0xe0   :  { %s231_s26 = scalar_lea.hbm %s328_s3, 128 }
  0xe1   :  { %p232_p5 = scmp.ne.s32.totalorder %s328_s3, %s231_s26  ;;  %p235_p6 = scmp.lt.u32.totalorder %s231_s26, %s328_s3 }
  0xe3   :  { %p237_p7 = pnand %p235_p6, %p232_p5 }
  0xe5   :  { %240 = shalt.err (!%p237_p7)
}
  0xe6   :  { %181 = dma.vmem_to_hbm [thread:$0]  %s179_s2, 128, %s328_s3, [#allocation3]  }
  0xe7   :  { %241 = dma.done.wait [#allocation3], 128  }
  0xe8   :  { %242 = vsyncadd [#allocation3], 4294967168 }
  0xe9   :  { %185 = vsyncpa [#allocation3], 1 }

</bundles_post_ra>
